<compile_context>
chip_gen: v7x
topology: tpu7x:2x2x1
jax: 0.10.0
libtpu: 0.0.40
codegen_flags: <defaults>
</compile_context>

<pallas_src>
import functools

import jax
import jax.numpy as jnp
from jax.experimental import pallas as pl
from jax.experimental.pallas import tpu as pltpu


def _round_up(x: int, m: int) -> int:
    return ((x + m - 1) // m) * m


def mlp_kernel(x_ref, w1_ref, b1_ref, w2_ref, b2_ref, w3_ref, b3_ref, out_ref,
               *, out_dim: int):
    """One batch-tile of the 3-layer MLP. All math accumulates in f32."""
    x = x_ref[...]

    # linear1 + ReLU
    h1 = jnp.dot(x, w1_ref[...], preferred_element_type=jnp.float32) + b1_ref[...]
    h1 = jnp.maximum(h1, 0.0)

    # linear2 + ReLU
    h2 = jnp.dot(h1, w2_ref[...], preferred_element_type=jnp.float32) + b2_ref[...]
    h2 = jnp.maximum(h2, 0.0)

    # linear3 (no activation). w3/b3 are lane-padded to 128 in VMEM so the
    # MXU result tile is 128-wide; only the true out_dim columns hit HBM.
    out = jnp.dot(h2, w3_ref[...], preferred_element_type=jnp.float32) + b3_ref[...]
    out_ref[...] = out[:, :out_dim].astype(out_ref.dtype)


def network_forward(x, params, *, block_batch=1024):
    """Forward pass of `Network`.

    x: [batch, in_features] f32
    params: (w1, b1, w2, b2, w3, b3); w_i: [in, out] f32, b_i: [1, out] f32.
    block_batch: rows per grid step. Default 1024; sweep 1024-4096. The tiles
        are small (tens of KiB) so even v7x's 32 MiB default scoped VMEM has
        large headroom.
    """
    w1, b1, w2, b2, w3, b3 = params
    batch, in_dim = x.shape
    h1_dim = w1.shape[1]
    h2_dim = w2.shape[1]
    out_dim = w3.shape[1]

    # --- Lane-pad ONLY the last-layer weight/bias (VMEM-side, for the MXU).
    # The HBM output keeps its true width out_dim.
    w3_pad = _round_up(max(out_dim, 128), 128)
    if w3_pad != out_dim:
        w3p = jnp.pad(w3, ((0, 0), (0, w3_pad - out_dim)))
        b3p = jnp.pad(b3, ((0, 0), (0, w3_pad - out_dim)))
    else:
        w3p, b3p = w3, b3

    # --- Batch tiling: tile size multiple of 8 (sublane rule). Ragged last
    # tile is handled by Pallas partial blocks; no jnp.pad HBM pass on x.
    tb = min(block_batch, _round_up(batch, 8))
    tb = max(8, _round_up(tb, 8))
    grid = (pl.cdiv(batch, tb),)

    # Weights/biases: full-array blocks, constant index_map -> VMEM-resident
    # across the whole grid (no re-DMA per step).
    def resident(arr):
        n = arr.ndim
        return pl.BlockSpec(arr.shape, lambda i: (0,) * n)

    flops = 2 * batch * (in_dim * h1_dim + h1_dim * h2_dim + h2_dim * out_dim)
    bytes_accessed = (
        batch * in_dim * 4                                          # x
        + (in_dim * h1_dim + h1_dim * h2_dim + h2_dim * out_dim) * 4  # W
        + (h1_dim + h2_dim + out_dim) * 4                            # biases
        + batch * out_dim * 4                                        # out
    )

    return pl.pallas_call(
        functools.partial(mlp_kernel, out_dim=out_dim),
        out_shape=jax.ShapeDtypeStruct((batch, out_dim), jnp.float32),
        grid_spec=pltpu.PrefetchScalarGridSpec(
            num_scalar_prefetch=0,
            grid=grid,
            in_specs=[
                pl.BlockSpec((tb, in_dim), lambda i: (i, 0)),  # x tile streams
                resident(w1), resident(b1),
                resident(w2), resident(b2),
                resident(w3p), resident(b3p),
            ],
            # Full-array lane dim (out_dim) is legal; masked 4-wide store is
            # fine because the store slot / VPU have huge slack here.
            out_specs=pl.BlockSpec((tb, out_dim), lambda i: (i, 0)),
        ),
        compiler_params=pltpu.CompilerParams(
            # Batch tiles are independent -> shard across v7x's 2 TensorCores.
            dimension_semantics=("parallel",),
        ),
        cost_estimate=pl.CostEstimate(
            flops=flops, transcendentals=0, bytes_accessed=bytes_accessed),
    )(x, w1, b1, w2, b2, w3p, b3p)


def init_params(key, channels):
    """Deterministic init mimicking nn.Linear's uniform(-1/sqrt(fan_in), +)."""
    params = []
    for i in range(3):
        fan_in, fan_out = channels[i], channels[i + 1]
        key, kw, kb = jax.random.split(key, 3)
        bound = 1.0 / (fan_in ** 0.5)
        w = jax.random.uniform(kw, (fan_in, fan_out), jnp.float32, -bound, bound)
        b = jax.random.uniform(kb, (1, fan_out), jnp.float32, -bound, bound)
        params += [w, b]
    return tuple(params)


def _reference(x, params):
    w1, b1, w2, b2, w3, b3 = params
    h1 = jnp.maximum(x @ w1 + b1, 0.0)
    h2 = jnp.maximum(h1 @ w2 + b2, 0.0)
    return h2 @ w3 + b3


# TODO(synk): loss/update/save/load (MSELoss, Adam step, checkpoint I/O) are
# training/host utilities, not part of the forward pass; not implemented.

if __name__ == "__main__":
    # channels = [in, hidden1, hidden2, out] as implied by Network.__init__
    channels = [16, 32, 32, 4]

    key = jax.random.PRNGKey(0)
    key, kp = jax.random.split(key)
    params = init_params(kp, channels)

    # Small-shape check (single grid step, tile of 8 rows).
    key, kx = jax.random.split(key)
    x_small = jax.random.normal(kx, (8, channels[0]), jnp.float32)
    out_small = network_forward(x_small, params)
    jax.block_until_ready(out_small)
    assert out_small.shape == (8, channels[3])
    assert jnp.allclose(out_small, _reference(x_small, params), atol=1e-5, rtol=1e-5), \
        "small-batch mismatch vs reference"

    # Multi-step grid with a ragged (partial) last batch tile: 44 rows,
    # tile 16 -> 2 full tiles + 1 partial tile (masked store, no jnp.pad).
    key, kx2 = jax.random.split(key)
    x_tiled = jax.random.normal(kx2, (44, channels[0]), jnp.float32)
    out_tiled = network_forward(x_tiled, params, block_batch=16)
    jax.block_until_ready(out_tiled)
    assert out_tiled.shape == (44, channels[3])
    assert jnp.allclose(out_tiled, _reference(x_tiled, params), atol=1e-5, rtol=1e-5), \
        "tiled-batch mismatch vs reference"

    print("KERNEL_OK")
</pallas_src>

<mosaic_0001>
module attributes {stable_mosaic.version = 11 : i64} {
  func.func @mlp_kernel(%arg0: i32, %arg1: memref<8x16xf32, #tpu.memory_space<vmem>>, %arg2: memref<16x32xf32, #tpu.memory_space<vmem>>, %arg3: memref<1x32xf32, #tpu.memory_space<vmem>>, %arg4: memref<32x32xf32, #tpu.memory_space<vmem>>, %arg5: memref<1x32xf32, #tpu.memory_space<vmem>>, %arg6: memref<32x128xf32, #tpu.memory_space<vmem>>, %arg7: memref<1x128xf32, #tpu.memory_space<vmem>>, %arg8: memref<8x4xf32, #tpu.memory_space<vmem>>) attributes {dimension_semantics = [#tpu.dimension_semantics<parallel>], iteration_bounds = array<i64: 1>, scalar_prefetch = 0 : i64, scratch_operands = 0 : i64, tpu.core_type = #tpu.core_type<tc>, window_params = [{transform_indices = @transform_0, window_bounds = array<i64: 8, 16>}, {pipeline_mode = #tpu.pipeline_mode<synchronous>, transform_indices = @transform_1, window_bounds = array<i64: 16, 32>}, {pipeline_mode = #tpu.pipeline_mode<synchronous>, transform_indices = @transform_2, window_bounds = array<i64: 1, 32>}, {pipeline_mode = #tpu.pipeline_mode<synchronous>, transform_indices = @transform_3, window_bounds = array<i64: 32, 32>}, {pipeline_mode = #tpu.pipeline_mode<synchronous>, transform_indices = @transform_4, window_bounds = array<i64: 1, 32>}, {pipeline_mode = #tpu.pipeline_mode<synchronous>, transform_indices = @transform_5, window_bounds = array<i64: 32, 128>}, {pipeline_mode = #tpu.pipeline_mode<synchronous>, transform_indices = @transform_6, window_bounds = array<i64: 1, 128>}, {transform_indices = @transform_7, window_bounds = array<i64: 8, 4>}]} {
    %c0 = arith.constant 0 : index
    %c0_0 = arith.constant 0 : index
    %0 = vector.load %arg1[%c0, %c0_0] : memref<8x16xf32, #tpu.memory_space<vmem>>, vector<8x16xf32>
    %c0_1 = arith.constant 0 : index
    %c0_2 = arith.constant 0 : index
    %1 = vector.load %arg2[%c0_1, %c0_2] : memref<16x32xf32, #tpu.memory_space<vmem>>, vector<16x32xf32>
    %cst = arith.constant dense<0.000000e+00> : vector<8x32xf32>
    %2 = tpu.matmul %0, %1, %cst {dimension_numbers = #tpu.dot_dimension_numbers<[1], [0], [0], [1], [0, 0, 1, 1], [], []>} : vector<8x16xf32>, vector<16x32xf32>, vector<8x32xf32> -> vector<8x32xf32>
    %c0_3 = arith.constant 0 : index
    %c0_4 = arith.constant 0 : index
    %3 = vector.load %arg3[%c0_3, %c0_4] : memref<1x32xf32, #tpu.memory_space<vmem>>, vector<1x32xf32>
    %4 = vector.broadcast %3 : vector<1x32xf32> to vector<8x32xf32>
    %5 = arith.addf %2, %4 : vector<8x32xf32>
    %cst_5 = arith.constant 0.000000e+00 : f32
    %6 = vector.broadcast %cst_5 : f32 to vector<8x32xf32>
    %7 = arith.maximumf %5, %6 : vector<8x32xf32>
    %c0_6 = arith.constant 0 : index
    %c0_7 = arith.constant 0 : index
    %8 = vector.load %arg4[%c0_6, %c0_7] : memref<32x32xf32, #tpu.memory_space<vmem>>, vector<32x32xf32>
    %cst_8 = arith.constant dense<0.000000e+00> : vector<8x32xf32>
    %9 = tpu.matmul %7, %8, %cst_8 {dimension_numbers = #tpu.dot_dimension_numbers<[1], [0], [0], [1], [0, 0, 1, 1], [], []>} : vector<8x32xf32>, vector<32x32xf32>, vector<8x32xf32> -> vector<8x32xf32>
    %c0_9 = arith.constant 0 : index
    %c0_10 = arith.constant 0 : index
    %10 = vector.load %arg5[%c0_9, %c0_10] : memref<1x32xf32, #tpu.memory_space<vmem>>, vector<1x32xf32>
    %11 = vector.broadcast %10 : vector<1x32xf32> to vector<8x32xf32>
    %12 = arith.addf %9, %11 : vector<8x32xf32>
    %cst_11 = arith.constant 0.000000e+00 : f32
    %13 = vector.broadcast %cst_11 : f32 to vector<8x32xf32>
    %14 = arith.maximumf %12, %13 : vector<8x32xf32>
    %c0_12 = arith.constant 0 : index
    %c0_13 = arith.constant 0 : index
    %15 = vector.load %arg6[%c0_12, %c0_13] : memref<32x128xf32, #tpu.memory_space<vmem>>, vector<32x128xf32>
    %cst_14 = arith.constant dense<0.000000e+00> : vector<8x128xf32>
    %16 = tpu.matmul %14, %15, %cst_14 {dimension_numbers = #tpu.dot_dimension_numbers<[1], [0], [0], [1], [0, 0, 1, 1], [], []>} : vector<8x32xf32>, vector<32x128xf32>, vector<8x128xf32> -> vector<8x128xf32>
    %c0_15 = arith.constant 0 : index
    %c0_16 = arith.constant 0 : index
    %17 = vector.load %arg7[%c0_15, %c0_16] : memref<1x128xf32, #tpu.memory_space<vmem>>, vector<1x128xf32>
    %18 = vector.broadcast %17 : vector<1x128xf32> to vector<8x128xf32>
    %19 = arith.addf %16, %18 : vector<8x128xf32>
    %20 = vector.extract_strided_slice %19 {offsets = [0, 0], sizes = [8, 4], strides = [1, 1]} : vector<8x128xf32> to vector<8x4xf32>
    %c0_17 = arith.constant 0 : index
    %c0_18 = arith.constant 0 : index
    %21 = vector.load %arg8[%c0_17, %c0_18] : memref<8x4xf32, #tpu.memory_space<vmem>>, vector<8x4xf32>
    tpu.vector_store %arg8[%c0_17, %c0_18], %20 {strides = array<i32>} : memref<8x4xf32, #tpu.memory_space<vmem>>, vector<8x4xf32>,
    return
  }
  func.func @transform_0(%arg0: i32) -> (i32, i32) {
    %c0_i32 = arith.constant 0 : i32
    %c0_i32_0 = arith.constant 0 : i32
    return %arg0, %c0_i32 : i32, i32
  }
  func.func @transform_1(%arg0: i32) -> (i32, i32) {
    %c0_i32 = arith.constant 0 : i32
    %c0_i32_0 = arith.constant 0 : i32
    %c0_i32_1 = arith.constant 0 : i32
    return %c0_i32, %c0_i32_0 : i32, i32
  }
  func.func @transform_2(%arg0: i32) -> (i32, i32) {
    %c0_i32 = arith.constant 0 : i32
    %c0_i32_0 = arith.constant 0 : i32
    %c0_i32_1 = arith.constant 0 : i32
    return %c0_i32, %c0_i32_0 : i32, i32
  }
  func.func @transform_3(%arg0: i32) -> (i32, i32) {
    %c0_i32 = arith.constant 0 : i32
    %c0_i32_0 = arith.constant 0 : i32
    %c0_i32_1 = arith.constant 0 : i32
    return %c0_i32, %c0_i32_0 : i32, i32
  }
  func.func @transform_4(%arg0: i32) -> (i32, i32) {
    %c0_i32 = arith.constant 0 : i32
    %c0_i32_0 = arith.constant 0 : i32
    %c0_i32_1 = arith.constant 0 : i32
    return %c0_i32, %c0_i32_0 : i32, i32
  }
  func.func @transform_5(%arg0: i32) -> (i32, i32) {
    %c0_i32 = arith.constant 0 : i32
    %c0_i32_0 = arith.constant 0 : i32
    %c0_i32_1 = arith.constant 0 : i32
    return %c0_i32, %c0_i32_0 : i32, i32
  }
  func.func @transform_6(%arg0: i32) -> (i32, i32) {
    %c0_i32 = arith.constant 0 : i32
    %c0_i32_0 = arith.constant 0 : i32
    %c0_i32_1 = arith.constant 0 : i32
    return %c0_i32, %c0_i32_0 : i32, i32
  }
  func.func @transform_7(%arg0: i32) -> (i32, i32) {
    %c0_i32 = arith.constant 0 : i32
    %c0_i32_0 = arith.constant 0 : i32
    return %arg0, %c0_i32 : i32, i32
  }
}

</mosaic_0001>

<bundles_post_ra>
// kernel: tpu_custom_call.1
= control target key start
LH: loop header
LB: loop body
LE: loop exit
PB: predicated region body
PF: predicated region fallthrough
CT: control target
= control target key end

     0   :  { %12 = vsyncpa [#allocation3], 0  ;;  %s630_s0 = inlined_call_operand.hbm [shape: f32[8,16], index: 0, kind: input, shape index: {}]   ;;  %s631_s1 = inlined_call_operand.hbm [shape: f32[16,32], index: 1, kind: input, shape index: {}]   ;;  %s632_s2 = inlined_call_operand.vmem [shape: f32[1,32], index: 2, kind: input, shape index: {}]   ;;  %s633_s3 = inlined_call_operand.hbm [shape: f32[32,32], index: 3, kind: input, shape index: {}]   ;;  %s634_s4 = inlined_call_operand.vmem [shape: f32[1,32], index: 4, kind: input, shape index: {}]   ;;  %s635_s5 = inlined_call_operand.hbm [shape: f32[32,128], index: 5, kind: input, shape index: {}]   ;;  %s636_s6 = inlined_call_operand.vmem [shape: f32[1,128], index: 6, kind: input, shape index: {}]   ;;  %s637_s7 = inlined_call_operand.vmem [shape: f32[8,4], index: 7, kind: output, shape index: {}]  }
   0x1   :  { %13 = vsyncpa [#allocation5], 0 }
   0x2   :  { %14 = vsyncpa [#allocation8], 0  ;;  %s509_s24 = smov [#allocation4]   ;;  %s415_s28 = scalar_lea.hbm %s631_s1, 256 }
   0x3   :  { %s30_s25 = sshll.u32 %s509_s24, 4  ;;  %p416_p0 = scmp.ne.s32.totalorder %s631_s1, %s415_s28  ;;  %s31_s25 = int_to_ptr.vmem [resolvable:$true] %s30_s25 }
   0x4   :  { %p419_p1 = scmp.lt.u32.totalorder %s415_s28, %s631_s1 }
   0x6   :  { %p421_p2 = pnand %p419_p1, %p416_p0 }
   0x8   :  { %424 = shalt.err (!%p421_p2)
}
   0x9   :  { %s425_s10 = scalar_lea.vmem %s31_s25, 256  ;;  %p430_p4 = scmp.lt.s32.totalorder %s31_s25, %s31_s25 }
   0xa   :  { %p426_p3 = scmp.ne.s32.totalorder %s31_s25, %s425_s10  ;;  %p431_p5 = scmp.lt.s32.totalorder %s425_s10, %s425_s10 }
   0xc   :  { %p432_p6 = por %p431_p5, %p430_p4 }
   0xe   :  { %p433_p7 = pnand %p432_p6, %p426_p3 }
  0x10   :  { %436 = shalt.err (!%p433_p7)
}
  0x11   :  { %s510_s11 = smov 128   ;;  %s511_s12 = smov 8  }
  0x12   :  { %36 = dma.hbm_to_vmem [thread:$0]  %s631_s1, 256, %s31_s25, [#allocation5], %s510_s11, %s510_s11, %s511_s12  }
  0x13   :  { %s512_s15 = smov [#allocation2]   ;;  %s513_s17 = smov [#allocation6]  }
  0x14   :  { %s21_s16 = sshll.u32 %s512_s15, 4  ;;  %s44_s18 = sshll.u32 %s513_s17, 4  ;;  %s22_s16 = int_to_ptr.vmem [resolvable:$true] %s21_s16  ;;  %s45_s18 = int_to_ptr.vmem [resolvable:$true] %s44_s18 }
  0x15   :  { %s437_s21 = scalar_lea.hbm %s630_s0, 128 }
  0x16   :  { %p438_p8 = scmp.ne.s32.totalorder %s630_s0, %s437_s21  ;;  %p441_p9 = scmp.lt.u32.totalorder %s437_s21, %s630_s0 }
  0x18   :  { %p443_p10 = pnand %p441_p9, %p438_p8 }
  0x1a   :  { %446 = shalt.err (!%p443_p10)
}
  0x1b   :  { %s447_s1 = scalar_lea.vmem %s22_s16, 128  ;;  %p452_p12 = scmp.lt.s32.totalorder %s22_s16, %s22_s16 }
  0x1c   :  { %p448_p11 = scmp.ne.s32.totalorder %s22_s16, %s447_s1  ;;  %p453_p13 = scmp.lt.s32.totalorder %s447_s1, %s447_s1 }
  0x1e   :  { %p454_p0 = por %p453_p13, %p452_p12 }
  0x20   :  { %p455_p1 = pnand %p454_p0, %p448_p11 }
  0x22   :  { %458 = shalt.err (!%p455_p1)
}
  0x23   :  { %24 = dma.hbm_to_vmem [thread:$0]  %s630_s0, 128, %s22_s16, [#allocation3]  }
  0x24   :  { %s459_s30 = scalar_lea.hbm %s633_s3, 512 }
  0x25   :  { %p460_p2 = scmp.ne.s32.totalorder %s633_s3, %s459_s30  ;;  %p463_p3 = scmp.lt.u32.totalorder %s459_s30, %s633_s3 }
  0x27   :  { %p465_p4 = pnand %p463_p3, %p460_p2 }
  0x29   :  { %468 = shalt.err (!%p465_p4)
}
  0x2a   :  { %s469_s14 = scalar_lea.vmem %s45_s18, 512  ;;  %p474_p6 = scmp.lt.s32.totalorder %s45_s18, %s45_s18 }
  0x2b   :  { %p470_p5 = scmp.ne.s32.totalorder %s45_s18, %s469_s14  ;;  %p475_p7 = scmp.lt.s32.totalorder %s469_s14, %s469_s14 }
  0x2d   :  { %p476_p8 = por %p475_p7, %p474_p6 }
  0x2f   :  { %p477_p9 = pnand %p476_p8, %p470_p5 }
  0x31   :  { %480 = shalt.err (!%p477_p9)
}
  0x32   :  { %50 = dma.hbm_to_vmem [thread:$0]  %s633_s3, 512, %s45_s18, [#allocation5], %s510_s11, %s510_s11, %s511_s12  }
  0x33   :  { %s514_s16 = smov [#allocation7]   ;;  %s481_s21 = scalar_lea.hbm %s635_s5, 512 }
  0x34   :  { %s58_s17 = sshll.u32 %s514_s16, 4  ;;  %p482_p10 = scmp.ne.s32.totalorder %s635_s5, %s481_s21  ;;  %s59_s17 = int_to_ptr.vmem [resolvable:$true] %s58_s17 }
  0x35   :  { %p485_p11 = scmp.lt.u32.totalorder %s481_s21, %s635_s5 }
  0x37   :  { %p487_p12 = pnand %p485_p11, %p482_p10 }
  0x39   :  { %490 = shalt.err (!%p487_p12)
}
  0x3a   :  { %s491_s1 = scalar_lea.vmem %s59_s17, 512  ;;  %p496_p0 = scmp.lt.s32.totalorder %s59_s17, %s59_s17 }
  0x3b   :  { %p492_p13 = scmp.ne.s32.totalorder %s59_s17, %s491_s1  ;;  %p497_p1 = scmp.lt.s32.totalorder %s491_s1, %s491_s1 }
  0x3d   :  { %p498_p2 = por %p497_p1, %p496_p0 }
  0x3f   :  { %p499_p3 = pnand %p498_p2, %p492_p13 }
  0x41   :  { %502 = shalt.err (!%p499_p3)
}
  0x42   :  { %64 = dma.hbm_to_vmem [thread:$0]  %s635_s5, 512, %s59_s17, [#allocation8], %s510_s11, %s510_s11, %s511_s12  }
  0x43   :  { %503 = dma.done.wait [#allocation3], 128  }
  0x44   :  { %504 = vsyncadd [#allocation3], 4294967168 }
  0x45   :  { %505 = dma.done.wait [#allocation5], 768  }
  0x46   :  { %506 = vsyncadd [#allocation5], 4294966528 }
  0x47   :  { %507 = dma.done.wait [#allocation8], 512  }
  0x48   :  { %508 = vsyncadd [#allocation8], 4294966784  ;;  %v515_v0 = vmov 0.0|0.0   ;;  %vm516_vm0 = vmmov 0   ;;  %v517_v1 = vmov 0.0   ;;  %v80_v2 = vld [vmem:[#allocation4] sm:$0xff] }
  0x49   :  { %391 = vmatprep.subr.bf16.mxu0 %v515_v0  ;;  %366 = vmatprep.mubr.msk.f32.mxu0 %vm516_vm0, %v517_v1  ;;  %v81_v3 = vld [vmem:[#allocation4 + $0x8] sm:$0xff]  ;;  %v164_v5 = vld [vmem:[#allocation6] sm:$0xff]  ;;  %v165_v6 = vld [vmem:[#allocation6 + $0x8] sm:$0xff]  ;;  %vm89_vm1 = vcmask 130048   ;;  %vm175_vm2 = vcmask 261120   ;;  %vm334_vm3 = vcmask 31744  }
  0x4a   :  { %394 = vmatprep.subr.bf16.mxu1 %v515_v0  ;;  %377 = vmatprep.mubr.msk.f32.mxu1 %vm516_vm0, %v517_v1  ;;  %v392_v4 = vpack.c.bf16 %v81_v3, %v80_v2  ;;  %v395_v7 = vpack.c.bf16 %v165_v6, %v164_v5  ;;  %v79_v8 = vld [vmem:[#allocation2] sm:$0xff]  ;;  %v166_v9 = vld [vmem:[#allocation6 + $0x10] sm:$0xff]  ;;  %v167_v10 = vld [vmem:[#allocation6 + $0x18] sm:$0xff] }
  0x4b   :  { %v398_v11 = vpack.c.bf16 %v167_v10, %v166_v9  ;;  %v250_v12 = vld [vmem:[#allocation7] sm:$0xff]  ;;  %v251_v13 = vld [vmem:[#allocation7 + $0x8] sm:$0xff]  ;;  %v252_v20 = vld [vmem:[#allocation7 + $0x10] sm:$0xff] }
  0x4c   :  { %393 = vmatpush3.bf16.msra.mxu0 %v392_v4  ;;  %396 = vmatpush3.bf16.msra.mxu1 %v395_v7  ;;  %v401_v14 = vpack.c.bf16 %v251_v13, %v250_v12  ;;  %v343_v15 = vld [vmem:[%s632_s2] ss:$0 sm:$0xff]  ;;  %v253_v21 = vld [vmem:[#allocation7 + $0x18] sm:$0xff] }
  0x4d   :  { %400 = vmatprep.subr.bf16.mxu0 %v515_v0  ;;  %397 = vmatprep.subr.bf16.mxu1 %v515_v0  ;;  %v404_v22 = vpack.c.bf16 %v253_v21, %v252_v20  ;;  %v345_v23 = vld [vmem:[%s634_s4] ss:$0 sm:$0xff] }
  0x4e   :  { %v347_v28 = vld [vmem:[%s636_s6] ss:$0 sm:$0xff] }
  0x4f   :  { %367 = vmatmul.mubr.msk.f32.vlgmr.msra.gmra.mrb[0].mxu0 %vm89_vm1, %v79_v8 }
  0x50   :  { %388 = vmatprep.mubr.msk.f32.mxu0 %vm516_vm0, %v517_v1  ;;  %399 = vmatpush3.bf16.msra.mxu1 %v398_v11 }
  0x51   :  { %402 = vmatpush3.bf16.msra.mxu0 %v401_v14 }
  0x52   :  { %403 = vmatprep.subr.bf16.mxu0 %v515_v0 }
  0x55   :  { %405 = vmatpush3.bf16.msra.mxu0 %v404_v22 }
 0x122   :  { %v159_v16 = vpop.f32.mrb[0].mxu0 }
 0x123   :  { %v160_v17 = vadd.f32 %v343_v15, %v159_v16  ;;  %v368_v18 = vpop.f32.mrb[1].mxu0 }
 0x125   :  { %v163_v19 = vmax.f32 %v160_v17, 0.0 }
 0x127   :  { %378 = vmatmul.mubr.msk.f32.vlgmr.msra.gmra.mrb[0].mxu1 %vm175_vm2, %v163_v19 }
 0x1fa   :  { %v245_v24 = vpop.f32.mrb[0].mxu1 }
 0x1fb   :  { %v246_v25 = vadd.f32 %v345_v23, %v245_v24  ;;  %v379_v26 = vpop.f32.mrb[1].mxu1 }
 0x1fd   :  { %v249_v27 = vmax.f32 %v246_v25, 0.0 }
 0x1ff   :  { %389 = vmatmul.mubr.msk.f32.vlgmr.msra.gmra.mrb[2].mxu0 %vm175_vm2, %v249_v27 }
 0x2d2   :  { %v330_v29 = vpop.f32.mrb[2].mxu0 }
 0x2d3   :  { %v331_v30 = vadd.f32 %v347_v28, %v330_v29  ;;  %v390_v31 = vpop.f32.mrb[3].mxu0 }
 0x2d5   :  { %335 = vst.msk [vmem:[%s637_s7] sm:$0xff] %vm334_vm3, %v331_v30 }
 0x2d6   :  { %340 = vsyncpa [#allocation3], 1 }
 0x2d7   :  { %341 = vsyncpa [#allocation5], 1 }
 0x2d8   :  { %342 = vsyncpa [#allocation8], 1 }

</bundles_post_ra>
